<compile_context>
chip_gen: v6e
topology: v6e:2x2x1
jax: 0.10.0
libtpu: 0.0.40
codegen_flags: <defaults>
</compile_context>

<pallas_src>
import jax
import jax.numpy as jnp
from jax.experimental import pallas as pl
from jax.experimental.pallas import tpu as pltpu

_EPS = 1e-12  # F.normalize default eps


def drug_cell_in_kernel(drug_ref, cell_ref, k_ref, q_ref, o_ref):
    # drug_ref: (Bt, N, F)   cell_ref: (Bt, F)
    # k_ref, q_ref: (F, F)   o_ref: (Bt, N)
    drug = drug_ref[...]
    cell = cell_ref[...]
    Bt, N, F = drug.shape

    # --- F.normalize(dim=-1): x / max(||x||_2, eps) ---
    d_nrm = jnp.sqrt(jnp.sum(drug * drug, axis=-1, keepdims=True))      # (Bt, N, 1)
    d = drug / jnp.maximum(d_nrm, _EPS)                                 # (Bt, N, F)
    c_nrm = jnp.sqrt(jnp.sum(cell * cell, axis=-1, keepdims=True))      # (Bt, 1)
    c = cell / jnp.maximum(c_nrm, _EPS)                                 # (Bt, F)

    # --- projections on the MXU; collapse leading dims so it's one matmul ---
    d2 = d.reshape(Bt * N, F)                                           # free reshape
    drug_p = jnp.dot(d2, k_ref[...],
                     preferred_element_type=jnp.float32).reshape(Bt, N, F)
    cell_p = jnp.dot(c, q_ref[...],
                     preferred_element_type=jnp.float32)                # (Bt, F)

    # --- interaction[b, n] = <cell_p[b], drug_p[b, n]>  (bmm(cell_, drug_^T)) ---
    inter = jnp.sum(drug_p * cell_p[:, None, :], axis=-1)               # (Bt, N)
    # --- similarity[b, n] = <c[b], d[b, n]>             (c @ d^T) ---
    sim = jnp.sum(d * c[:, None, :], axis=-1)                           # (Bt, N)

    # --- softmax over the drug axis (torch dim=2 == last axis here) ---
    m = jnp.max(inter, axis=-1, keepdims=True)
    e = jnp.exp(inter - m)
    attn = e / jnp.sum(e, axis=-1, keepdims=True)

    o_ref[...] = (attn * sim).astype(o_ref.dtype)


def drug_cell_in(drug, cell, k, q):
    B, N, F = drug.shape
    Bt = B                      # all batch elements in a single grid step
    grid = (B // Bt,)
    return pl.pallas_call(
        drug_cell_in_kernel,
        out_shape=jax.ShapeDtypeStruct((B, N), jnp.float32),
        grid_spec=pltpu.PrefetchScalarGridSpec(
            num_scalar_prefetch=0,
            grid=grid,
            in_specs=[
                pl.BlockSpec((Bt, N, F), lambda i: (i, 0, 0)),
                pl.BlockSpec((Bt, F), lambda i: (i, 0)),
                pl.BlockSpec((F, F), lambda i: (0, 0)),
                pl.BlockSpec((F, F), lambda i: (0, 0)),
            ],
            out_specs=pl.BlockSpec((Bt, N), lambda i: (i, 0)),
        ),
        compiler_params=pltpu.CompilerParams(
            dimension_semantics=("arbitrary",)),
    )(drug, cell, k, q)


def xavier_uniform(key, shape):
    fan_in, fan_out = shape[0], shape[1]
    bound = (6.0 / (fan_in + fan_out)) ** 0.5
    return jax.random.uniform(key, shape, jnp.float32, -bound, bound)


def reference(drug, cell, k, q):
    d = drug / jnp.maximum(jnp.linalg.norm(drug, axis=-1, keepdims=True), _EPS)
    c = cell.reshape(cell.shape[0], 1, cell.shape[1])
    c = c / jnp.maximum(jnp.linalg.norm(c, axis=-1, keepdims=True), _EPS)
    drug_p = d @ k                                        # (B, N, F)
    cell_p = c @ q                                        # (B, 1, F)
    inter = jnp.einsum('bif,bnf->bin', cell_p, drug_p)    # (B, 1, N)
    attn = jax.nn.softmax(inter, axis=2)
    sim = jnp.einsum('bif,bnf->bin', c, d)                # (B, 1, N)
    out = attn * sim
    return out.reshape(out.shape[0], out.shape[2])        # (B, N)


if __name__ == "__main__":
    # Small, module-consistent shapes: drug (B, N, F), cell (B, F), params (F, F).
    B, N, F = 2, 8, 32

    key = jax.random.PRNGKey(0)
    kd, kc, kk, kq = jax.random.split(key, 4)

    drug = jax.random.normal(kd, (B, N, F), jnp.float32)
    cell = jax.random.normal(kc, (B, F), jnp.float32)
    k = xavier_uniform(kk, (F, F))
    q = xavier_uniform(kq, (F, F))

    out = drug_cell_in(drug, cell, k, q)
    out = jax.block_until_ready(out)

    ref = reference(drug, cell, k, q)
    assert out.shape == (B, N)
    assert jnp.allclose(out, ref, atol=5e-5, rtol=5e-5), float(
        jnp.max(jnp.abs(out - ref)))

    print("KERNEL_OK")
</pallas_src>

<mosaic_0001>
module attributes {stable_mosaic.version = 11 : i64} {
  func.func @drug_cell_in_kernel(%arg0: i32, %arg1: memref<2x8x32xf32, #tpu.memory_space<vmem>>, %arg2: memref<2x32xf32, #tpu.memory_space<vmem>>, %arg3: memref<32x32xf32, #tpu.memory_space<vmem>>, %arg4: memref<32x32xf32, #tpu.memory_space<vmem>>, %arg5: memref<2x8xf32, #tpu.memory_space<vmem>>) attributes {dimension_semantics = [#tpu.dimension_semantics<arbitrary>], iteration_bounds = array<i64: 1>, scalar_prefetch = 0 : i64, scratch_operands = 0 : i64, tpu.core_type = #tpu.core_type<tc>, window_params = [{transform_indices = @transform_0, window_bounds = array<i64: 2, 8, 32>}, {transform_indices = @transform_1, window_bounds = array<i64: 2, 32>}, {pipeline_mode = #tpu.pipeline_mode<synchronous>, transform_indices = @transform_2, window_bounds = array<i64: 32, 32>}, {pipeline_mode = #tpu.pipeline_mode<synchronous>, transform_indices = @transform_3, window_bounds = array<i64: 32, 32>}, {transform_indices = @transform_4, window_bounds = array<i64: 2, 8>}]} {
    %c0 = arith.constant 0 : index
    %c0_0 = arith.constant 0 : index
    %c0_1 = arith.constant 0 : index
    %0 = vector.load %arg1[%c0, %c0_0, %c0_1] : memref<2x8x32xf32, #tpu.memory_space<vmem>>, vector<2x8x32xf32>
    %c0_2 = arith.constant 0 : index
    %c0_3 = arith.constant 0 : index
    %1 = vector.load %arg2[%c0_2, %c0_3] : memref<2x32xf32, #tpu.memory_space<vmem>>, vector<2x32xf32>
    %2 = arith.mulf %0, %0 : vector<2x8x32xf32>
    %cst = arith.constant dense<0.000000e+00> : vector<2x8xf32>
    %3 = vector.multi_reduction <add>, %2, %cst [2] : vector<2x8x32xf32> to vector<2x8xf32>
    %4 = vector.shape_cast %3 : vector<2x8xf32> to vector<2x8x1xf32>
    %5 = math.sqrt %4 : vector<2x8x1xf32>
    %cst_4 = arith.constant 9.99999996E-13 : f32
    %6 = vector.broadcast %cst_4 : f32 to vector<2x8x1xf32>
    %7 = arith.maximumf %5, %6 : vector<2x8x1xf32>
    %8 = vector.broadcast %7 : vector<2x8x1xf32> to vector<2x8x32xf32>
    %9 = arith.divf %0, %8 : vector<2x8x32xf32>
    %10 = arith.mulf %1, %1 : vector<2x32xf32>
    %cst_5 = arith.constant dense<0.000000e+00> : vector<2xf32>
    %11 = vector.multi_reduction <add>, %10, %cst_5 [1] : vector<2x32xf32> to vector<2xf32>
    %12 = vector.shape_cast %11 : vector<2xf32> to vector<2x1xf32>
    %13 = math.sqrt %12 : vector<2x1xf32>
    %cst_6 = arith.constant 9.99999996E-13 : f32
    %14 = vector.broadcast %cst_6 : f32 to vector<2x1xf32>
    %15 = arith.maximumf %13, %14 : vector<2x1xf32>
    %16 = vector.broadcast %15 : vector<2x1xf32> to vector<2x32xf32>
    %17 = arith.divf %1, %16 : vector<2x32xf32>
    %18 = vector.shape_cast %9 : vector<2x8x32xf32> to vector<16x32xf32>
    %c0_7 = arith.constant 0 : index
    %c0_8 = arith.constant 0 : index
    %19 = vector.load %arg3[%c0_7, %c0_8] : memref<32x32xf32, #tpu.memory_space<vmem>>, vector<32x32xf32>
    %cst_9 = arith.constant dense<0.000000e+00> : vector<16x32xf32>
    %20 = tpu.matmul %18, %19, %cst_9 {dimension_numbers = #tpu.dot_dimension_numbers<[1], [0], [0], [1], [0, 0, 1, 1], [], []>} : vector<16x32xf32>, vector<32x32xf32>, vector<16x32xf32> -> vector<16x32xf32>
    %21 = vector.shape_cast %20 : vector<16x32xf32> to vector<2x8x32xf32>
    %c0_10 = arith.constant 0 : index
    %c0_11 = arith.constant 0 : index
    %22 = vector.load %arg4[%c0_10, %c0_11] : memref<32x32xf32, #tpu.memory_space<vmem>>, vector<32x32xf32>
    %cst_12 = arith.constant dense<0.000000e+00> : vector<2x32xf32>
    %23 = tpu.matmul %17, %22, %cst_12 {dimension_numbers = #tpu.dot_dimension_numbers<[1], [0], [0], [1], [0, 0, 1, 1], [], []>} : vector<2x32xf32>, vector<32x32xf32>, vector<2x32xf32> -> vector<2x32xf32>
    %24 = vector.shape_cast %23 : vector<2x32xf32> to vector<2x1x32xf32>
    %25 = vector.broadcast %24 : vector<2x1x32xf32> to vector<2x8x32xf32>
    %26 = arith.mulf %21, %25 : vector<2x8x32xf32>
    %cst_13 = arith.constant dense<0.000000e+00> : vector<2x8xf32>
    %27 = vector.multi_reduction <add>, %26, %cst_13 [2] : vector<2x8x32xf32> to vector<2x8xf32>
    %28 = vector.shape_cast %17 : vector<2x32xf32> to vector<2x1x32xf32>
    %29 = vector.broadcast %28 : vector<2x1x32xf32> to vector<2x8x32xf32>
    %30 = arith.mulf %9, %29 : vector<2x8x32xf32>
    %cst_14 = arith.constant dense<0.000000e+00> : vector<2x8xf32>
    %31 = vector.multi_reduction <add>, %30, %cst_14 [2] : vector<2x8x32xf32> to vector<2x8xf32>
    %cst_15 = arith.constant dense<0xFF800000> : vector<2xf32>
    %32 = vector.multi_reduction <maximumf>, %27, %cst_15 [1] : vector<2x8xf32> to vector<2xf32>
    %33 = vector.shape_cast %32 : vector<2xf32> to vector<2x1xf32>
    %34 = vector.broadcast %33 : vector<2x1xf32> to vector<2x8xf32>
    %35 = arith.subf %27, %34 : vector<2x8xf32>
    %36 = math.exp %35 : vector<2x8xf32>
    %cst_16 = arith.constant dense<0.000000e+00> : vector<2xf32>
    %37 = vector.multi_reduction <add>, %36, %cst_16 [1] : vector<2x8xf32> to vector<2xf32>
    %38 = vector.shape_cast %37 : vector<2xf32> to vector<2x1xf32>
    %39 = vector.broadcast %38 : vector<2x1xf32> to vector<2x8xf32>
    %40 = arith.divf %36, %39 : vector<2x8xf32>
    %41 = arith.mulf %40, %31 : vector<2x8xf32>
    %c0_17 = arith.constant 0 : index
    %c0_18 = arith.constant 0 : index
    %42 = vector.load %arg5[%c0_17, %c0_18] : memref<2x8xf32, #tpu.memory_space<vmem>>, vector<2x8xf32>
    tpu.vector_store %arg5[%c0_17, %c0_18], %41 {strides = array<i32>} : memref<2x8xf32, #tpu.memory_space<vmem>>, vector<2x8xf32>,
    return
  }
  func.func @transform_0(%arg0: i32) -> (i32, i32, i32) {
    %c0_i32 = arith.constant 0 : i32
    %c0_i32_0 = arith.constant 0 : i32
    %c0_i32_1 = arith.constant 0 : i32
    return %arg0, %c0_i32, %c0_i32_0 : i32, i32, i32
  }
  func.func @transform_1(%arg0: i32) -> (i32, i32) {
    %c0_i32 = arith.constant 0 : i32
    %c0_i32_0 = arith.constant 0 : i32
    return %arg0, %c0_i32 : i32, i32
  }
  func.func @transform_2(%arg0: i32) -> (i32, i32) {
    %c0_i32 = arith.constant 0 : i32
    %c0_i32_0 = arith.constant 0 : i32
    %c0_i32_1 = arith.constant 0 : i32
    return %c0_i32, %c0_i32_0 : i32, i32
  }
  func.func @transform_3(%arg0: i32) -> (i32, i32) {
    %c0_i32 = arith.constant 0 : i32
    %c0_i32_0 = arith.constant 0 : i32
    %c0_i32_1 = arith.constant 0 : i32
    return %c0_i32, %c0_i32_0 : i32, i32
  }
  func.func @transform_4(%arg0: i32) -> (i32, i32) {
    %c0_i32 = arith.constant 0 : i32
    %c0_i32_0 = arith.constant 0 : i32
    return %arg0, %c0_i32 : i32, i32
  }
}

</mosaic_0001>

<bundles_post_ra>
// kernel: tpu_custom_call.1
= control target key start
LH: loop header
LB: loop body
LE: loop exit
PB: predicated region body
PF: predicated region fallthrough
CT: control target
= control target key end

     0   :  { %9 = vsyncpa [#allocation3], 0  ;;  %s743_s0 = inlined_call_operand.hbm [shape: f32[2,8,32], index: 0, kind: input, shape index: {}]   ;;  %s744_s1 = inlined_call_operand.hbm [shape: f32[2,32], index: 1, kind: input, shape index: {}]   ;;  %s745_s2 = inlined_call_operand.hbm [shape: f32[32,32], index: 2, kind: input, shape index: {}]   ;;  %s746_s3 = inlined_call_operand.hbm [shape: f32[32,32], index: 3, kind: input, shape index: {}]   ;;  %s747_s4 = inlined_call_operand.hbm [shape: f32[2,8], index: 4, kind: output, shape index: {}]  }
   0x1   :  { %10 = vsyncpa [#allocation6], 0 }
   0x2   :  { %11 = vsyncpa [#allocation9], 0 }
   0x3   :  { %12 = vsyncpa [#allocation4], 0  ;;  %s648_s15 = smov [#allocation5]   ;;  %s649_s17 = smov [#allocation2]  }
   0x4   :  { %s31_s16 = sshll.u32 %s648_s15, 4  ;;  %s18_s18 = sshll.u32 %s649_s17, 4  ;;  %s32_s16 = int_to_ptr.vmem [resolvable:$true] %s31_s16  ;;  %s19_s18 = int_to_ptr.vmem [resolvable:$true] %s18_s18 }
   0x5   :  { %s548_s19 = scalar_lea.vmem %s32_s16, 32  ;;  %p553_p1 = scmp.lt.s32.totalorder %s32_s16, %s32_s16 }
   0x6   :  { %p549_p0 = scmp.ne.s32.totalorder %s32_s16, %s548_s19  ;;  %p554_p2 = scmp.lt.s32.totalorder %s548_s19, %s548_s19 }
   0x8   :  { %p555_p3 = por %p554_p2, %p553_p1 }
   0xa   :  { %p556_p4 = pnand %p555_p3, %p549_p0 }
   0xc   :  { %559 = shalt.err (!%p556_p4)
}
   0xd   :  { %34 = dma.hbm_to_vmem [thread:$0]  %s744_s1, 32, %s32_s16, [#allocation6]  }
   0xe   :  { %s568_s22 = scalar_lea.vmem %s19_s18, 256  ;;  %p573_p6 = scmp.lt.s32.totalorder %s19_s18, %s19_s18 }
   0xf   :  { %p569_p5 = scmp.ne.s32.totalorder %s19_s18, %s568_s22  ;;  %p574_p7 = scmp.lt.s32.totalorder %s568_s22, %s568_s22 }
  0x11   :  { %p575_p8 = por %p574_p7, %p573_p6 }
  0x13   :  { %p576_p9 = pnand %p575_p8, %p569_p5 }
  0x15   :  { %579 = shalt.err (!%p576_p9)
}
  0x16   :  { %s650_s23 = smov 128   ;;  %s651_s24 = smov 8  }
  0x17   :  { %24 = dma.hbm_to_vmem [thread:$0]  %s743_s0, 256, %s19_s18, [#allocation3], %s650_s23, %s650_s23, %s651_s24  }
  0x18   :  { %s652_s27 = smov [#allocation7]   ;;  %s653_s29 = smov [#allocation8]  }
  0x19   :  { %s40_s28 = sshll.u32 %s652_s27, 4  ;;  %s52_s30 = sshll.u32 %s653_s29, 4  ;;  %s41_s28 = int_to_ptr.vmem [resolvable:$true] %s40_s28  ;;  %s53_s30 = int_to_ptr.vmem [resolvable:$true] %s52_s30 }
  0x1a   :  { %s588_s1 = scalar_lea.vmem %s41_s28, 512  ;;  %p593_p11 = scmp.lt.s32.totalorder %s41_s28, %s41_s28 }
  0x1b   :  { %p589_p10 = scmp.ne.s32.totalorder %s41_s28, %s588_s1  ;;  %p594_p12 = scmp.lt.s32.totalorder %s588_s1, %s588_s1 }
  0x1d   :  { %p595_p13 = por %p594_p12, %p593_p11 }
  0x1f   :  { %p596_p0 = pnand %p595_p13, %p589_p10 }
  0x21   :  { %599 = shalt.err (!%p596_p0)
}
  0x22   :  { %46 = dma.hbm_to_vmem [thread:$0]  %s745_s2, 512, %s41_s28, [#allocation6], %s650_s23, %s650_s23, %s651_s24  }
  0x23   :  { %s608_s7 = scalar_lea.vmem %s53_s30, 512  ;;  %p613_p2 = scmp.lt.s32.totalorder %s53_s30, %s53_s30 }
  0x24   :  { %p609_p1 = scmp.ne.s32.totalorder %s53_s30, %s608_s7  ;;  %p614_p3 = scmp.lt.s32.totalorder %s608_s7, %s608_s7 }
  0x26   :  { %p615_p4 = por %p614_p3, %p613_p2 }
  0x28   :  { %p616_p5 = pnand %p615_p4, %p609_p1 }
  0x2a   :  { %619 = shalt.err (!%p616_p5)
}
  0x2b   :  { %58 = dma.hbm_to_vmem [thread:$0]  %s746_s3, 512, %s53_s30, [#allocation9], %s650_s23, %s650_s23, %s651_s24  }
  0x2c   :  { %640 = dma.done.wait [#allocation3], 256  }
  0x2d   :  { %641 = vsyncadd [#allocation3], 4294967040 }
  0x2e   :  { %642 = dma.done.wait [#allocation6], 544  }
  0x2f   :  { %643 = vsyncadd [#allocation6], 4294966752 }
  0x30   :  { %644 = dma.done.wait [#allocation9], 512  }
  0x31   :  { %645 = vsyncadd [#allocation9], 4294966784  ;;  %v696_v0 = vld [vmem:[#allocation5] sm:$0x3]  ;;  %vm104_vm0 = vcmask 254976   ;;  %v698_v1 = vld [vmem:[#allocation2 + $0x8] sm:$0xff]  ;;  %v284_v41 = vlaneseq }
  0x32   :  { %vm76_vm1 = vcmask 261120   ;;  %v700_v2 = vld [vmem:[#allocation2] sm:$0xff]  ;;  %v103_v3 = vmul.f32 %v696_v0, %v696_v0  ;;  %v75_v4 = vmul.f32 %v698_v1, %v698_v1  ;;  %v206_v9 = vld [vmem:[#allocation8 + $0x18] sm:$0xff]  ;;  %v654_v11 = vmov 0.0   ;;  %v203_v15 = vld [vmem:[#allocation8] sm:$0xff]  ;;  %s658_s2 = smov [#allocation10]  }
  0x33   :  { %v74_v5 = vmul.f32 %v700_v2, %v700_v2  ;;  %v121_v10 = vld [vmem:[#allocation7 + $0x18] sm:$0xff]  ;;  %496 = vmatprep.subr.mxu1 %v654_v11  ;;  %v205_v12 = vld [vmem:[#allocation8 + $0x10] sm:$0xff]  ;;  %v204_v14 = vld [vmem:[#allocation8 + $0x8] sm:$0xff]  ;;  %vm655_vm2 = vmmov 0   ;;  %v656_v39 = vmov 1966171168  }
  0x34   :  { %v105_v6 = vsel %vm104_vm0, %v103_v3, 0.0  ;;  %v80_v7 = vsel %vm76_vm1, %v75_v4, 0.0  ;;  %485 = vmatprep.subr.mxu0 %v121_v10  ;;  %v120_v13 = vld [vmem:[#allocation7 + $0x10] sm:$0xff]  ;;  %497 = vmatpush3.msra.mxu1 %v206_v9  ;;  %v119_v16 = vld [vmem:[#allocation7 + $0x8] sm:$0xff]  ;;  %v118_v17 = vld [vmem:[#allocation7] sm:$0xff]  ;;  %v282_v40 = vunpack.c.l.s4 %v656_v39  ;;  %v710_v43 = vshrl.u32 %v284_v41, 7 }
  0x35   :  { %106 = vadd.xlane.f32.xlu0 %v105_v6  ;;  %81 = vadd.xlane.f32.xlu1 %v80_v7  ;;  %v77_v8 = vsel %vm76_vm1, %v74_v5, 0.0  ;;  %vm373_vm9 = vcmask 1041409   ;;  %vm376_vm10 = vcmask 58368   ;;  %s460_s3 = sshll.u32 %s658_s2, 4  ;;  %s461_s3 = int_to_ptr.vmem [resolvable:$true] %s460_s3 }
  0x36   :  { %486 = vmatpush3.msra.mxu0 %v121_v10  ;;  %498 = vmatprep.subr.mxu1 %v654_v11  ;;  %v283_v42 = vunpack.c.0.s8 %v282_v40  ;;  %v716_v48 = vsub.s32 0, %v710_v43  ;;  %v364_v10 = vand.u32 127, %v284_v41  ;;  %s620_s9 = scalar_lea.vmem %s461_s3, 32  ;;  %p625_p7 = scmp.lt.s32.totalorder %s461_s3, %s461_s3 }
  0x37   :  { %487 = vmatprep.subr.mxu0 %v120_v13  ;;  %499 = vmatpush3.msra.mxu1 %v205_v12  ;;  %p621_p6 = scmp.ne.s32.totalorder %s461_s3, %s620_s9  ;;  %p626_p8 = scmp.lt.s32.totalorder %s620_s9, %s620_s9 }
  0x38   :  { %504 = vmatprep.mubr.msk.f32.mxu1 %vm655_vm2, %v654_v11  ;;  %500 = vmatprep.subr.mxu1 %v654_v11  ;;  %v286_v44 = vsub.s32 %v283_v42, %v710_v43 }
  0x39   :  { %78 = vadd.xlane.f32.xlu0 %v77_v8  ;;  %488 = vmatpush3.msra.mxu0 %v120_v13  ;;  %p627_p9 = por %p626_p8, %p625_p7 }
  0x3a   :  { %501 = vmatpush3.msra.mxu1 %v204_v14  ;;  %489 = vmatprep.subr.mxu0 %v119_v16 }
  0x3b   :  { %502 = vmatprep.subr.mxu1 %v654_v11  ;;  %490 = vmatpush3.msra.mxu0 %v119_v16  ;;  %v367_v11 = vsub.s32 %v364_v10, %v710_v43  ;;  %p628_p10 = pnand %p627_p9, %p621_p6 }
  0x3c   :  { %503 = vmatpush3.msra.mxu1 %v203_v15  ;;  %491 = vmatprep.subr.mxu0 %v118_v17 }
  0x3d   :  { %492 = vmatpush3.msra.mxu0 %v118_v17 }
  0xbe   :  { %v107_v18 = vpop.xlane.xlu0 %106  ;;  %v82_v19 = vpop.xlane.xlu1 %81 }
  0xbf   :  { %520 = vrsqrt.f32 %v107_v18  ;;  %vm110_vm3 = vcmp.eq.f32.partialorder %v107_v18, inf  ;;  %v113_v24 = vand.u32 2147483648, %v107_v18  ;;  %vm112_vm4 = vcmp.eq.f32.partialorder %v107_v18, 0.0 }
  0xc0   :  { %522 = vrsqrt.f32 %v82_v19  ;;  %vm92_vm5 = vcmp.eq.f32.partialorder %v82_v19, inf  ;;  %v95_v27 = vand.u32 2147483648, %v82_v19  ;;  %vm94_vm6 = vcmp.eq.f32.partialorder %v82_v19, 0.0 }
  0xc2   :  { %v79_v20 = vpop.xlane.xlu0 %78 }
  0xc3   :  { %524 = vrsqrt.f32 %v79_v20  ;;  %vm85_vm7 = vcmp.eq.f32.partialorder %v79_v20, inf  ;;  %v88_v35 = vand.u32 2147483648, %v79_v20  ;;  %vm87_vm8 = vcmp.eq.f32.partialorder %v79_v20, 0.0 }
  0xcc   :  { %v521_v21 = vpop.eup %520 }
  0xcd   :  { %v523_v22 = vpop.eup %522  ;;  %v109_v23 = vmul.f32 %v521_v21, %v107_v18 }
  0xce   :  { %v91_v25 = vmul.f32 %v523_v22, %v82_v19 }
  0xcf   :  { %v111_v26 = vsel %vm110_vm3, %v107_v18, %v109_v23  ;;  %v657_v18 = vmov 0  }
  0xd0   :  { %v525_v28 = vpop.eup %524  ;;  %v114_v29 = vsel %vm112_vm4, %v113_v24, %v111_v26  ;;  %v93_v30 = vsel %vm92_vm5, %v82_v19, %v91_v25  ;;  %519 = vset.pattern.permute.xlu1 %v657_v18  ;;  %518 = vset.pattern.permute.xlu0 %v657_v18  ;;  %v387_v19 = vsub.s32 1, %v710_v43 }
  0xd1   :  { %v115_v31 = vmax.f32 %v114_v29, 1e-12  ;;  %v96_v32 = vsel %vm94_vm6, %v95_v27, %v93_v30  ;;  %v84_v33 = vmul.f32 %v525_v28, %v79_v20 }
  0xd2   :  { %v98_v34 = vmax.f32 %v96_v32, 1e-12 }
  0xd3   :  { %526 = vrcp.f32 %v115_v31  ;;  %v86_v36 = vsel %vm85_vm7, %v79_v20, %v84_v33 }
  0xd4   :  { %v89_v37 = vsel %vm87_vm8, %v88_v35, %v86_v36  ;;  %528 = vrcp.f32 %v98_v34 }
  0xd5   :  { %v97_v38 = vmax.f32 %v89_v37, 1e-12 }
  0xd7   :  { %530 = vrcp.f32 %v97_v38 }
  0xe0   :  { %v527_v45 = vpop.eup %526 }
  0xe1   :  { %v117_v46 = vmul.f32 %v527_v45, %v696_v0  ;;  %v529_v47 = vpop.eup %528 }
  0xe2   :  { %v102_v54 = vmul.f32 %v529_v47, %v698_v1 }
  0xe3   :  { %505 = vmatmul.mubr.msk.f32.vlgmr.msra.gmra.mxu1 %vm76_vm1, %v117_v46  ;;  %v327_v49 = vrot.slane %v117_v46, %v286_v44 }
  0xe4   :  { %v531_v50 = vpop.eup %530 }
  0xe5   :  { %v100_v51 = vmul.f32 %v531_v50, %v700_v2  ;;  %v335_v52 = vrot.slane %v327_v49, %v286_v44  ;;  %v328_v53 = vcombine.high %v327_v49, %v327_v49 }
  0xe7   :  { %493 = vmatprep.mubr.msk.f32.mxu0 %vm76_vm1, %v100_v51  ;;  %v346_v55 = vrot.slane %v335_v52, %v716_v48  ;;  %v342_v56 = vrot.slane %v328_v53, %v286_v44 }
  0xe8   :  { %494 = vmatmul.mubr.msk.f32.vlgmr.msra.gmra.mxu0 %vm76_vm1, %v102_v54 }
  0xe9   :  { %v353_v57 = vmul.f32 %v346_v55, %v100_v51  ;;  %v350_v58 = vrot.slane %v342_v56, %v716_v48 }
  0xeb   :  { %v354_v59 = vmul.f32 %v350_v58, %v102_v54  ;;  %v355_v29 = vsel %vm76_vm1, %v353_v57, 0.0 }
  0xed   :  { %v358_v36 = vsel %vm76_vm1, %v354_v59, 0.0 }
 0x1a3   :  { %v276_v60 = vpop.f32.mrf.mxu1 }
 0x1a4   :  { %v287_v61 = vrot.slane %v276_v60, %v286_v44 }
 0x1a5   :  { %v506_v62 = vpop.f32.mrf.mxu1 }
 0x1a6   :  { %v288_v63 = vcombine.high %v287_v61, %v287_v61  ;;  %v295_v0 = vrot.slane %v287_v61, %v286_v44 }
 0x1a8   :  { %v495_v2 = vpop.f32.mrf.mxu0  ;;  %v302_v3 = vrot.slane %v288_v63, %v286_v44  ;;  %v306_v1 = vrot.slane %v295_v0, %v716_v48 }
 0x1aa   :  { %v310_v4 = vrot.slane %v302_v3, %v716_v48  ;;  %v194_v5 = vpop.f32.mrf.mxu0 }
 0x1ab   :  { %v313_v6 = vmul.f32 %v306_v1, %v194_v5 }
 0x1ac   :  { %v314_v7 = vmul.f32 %v495_v2, %v310_v4 }
 0x1ad   :  { %v315_v8 = vsel %vm76_vm1, %v313_v6, 0.0 }
 0x1ae   :  { %316 = vadd.xlane.f32.xlu1 %v315_v8  ;;  %v318_v9 = vsel %vm76_vm1, %v314_v7, 0.0 }
 0x1af   :  { %319 = vadd.xlane.f32.xlu0 %v318_v9 }
 0x237   :  { %v317_v12 = vpop.xlane.xlu1 %316 }
 0x238   :  { %v368_v13 = vrot.slane %v317_v12, %v367_v11  ;;  %v320_v14 = vpop.xlane.xlu0 %319 }
 0x239   :  { %v372_v15 = vrot.slane %v320_v14, %v367_v11 }
 0x23b   :  { %v374_v16 = vsel %vm373_vm9, %v372_v15, %v368_v13 }
 0x23c   :  { %v377_v17 = vsel %vm376_vm10, %v374_v16, -inf }
 0x23d   :  { %378 = vmax.xlane.f32.xlu1 %v377_v17 }
 0x2c6   :  { %v379_v20 = vpop.xlane.xlu1 %378 }
 0x2c7   :  { %v384_v21 = vrot.slane %v379_v20, %v716_v48  ;;  %v388_v22 = vrot.slane %v379_v20, %v387_v19 }
 0x2c9   :  { %v391_v23 = vsub.f32 %v317_v12, %v384_v21  ;;  %v392_v24 = vsub.f32 %v320_v14, %v388_v22 }
 0x2cb   :  { %v393_v25 = vmul.f32 1.442695, %v391_v23  ;;  %v395_v26 = vmul.f32 1.442695, %v392_v24 }
 0x2cd   :  { %532 = vpow2.f32 %v393_v25 }
 0x2ce   :  { %534 = vpow2.f32 %v395_v26 }
 0x2da   :  { %v533_v27 = vpop.eup %532 }
 0x2db   :  { %v535_v28 = vpop.eup %534  ;;  %400 = vperm.xlu0 %518, %v533_v27  }
 0x2dc   :  { %403 = vperm.xlu1 %519, %v535_v28  }
 0x2fa   :  { %356 = vadd.xlane.f32.xlu0 %v355_v29 }
 0x356   :  { %v401_v30 = vpop.permute.xlu0 %400 }
 0x357   :  { %v404_v31 = vpop.permute.xlu1 %403  ;;  %v408_v32 = vrot.slane %v401_v30, %v367_v11 }
 0x358   :  { %v412_v33 = vrot.slane %v404_v31, %v367_v11 }
 0x35a   :  { %v413_v34 = vsel %vm373_vm9, %v412_v33, %v408_v32 }
 0x35b   :  { %v415_v35 = vsel %vm376_vm10, %v413_v34, 0.0 }
 0x35c   :  { %416 = vadd.xlane.f32.xlu1 %v415_v35 }
 0x360   :  { %359 = vadd.xlane.f32.xlu1 %v358_v36 }
 0x383   :  { %v357_v43 = vpop.xlane.xlu0 %356 }
 0x3e5   :  { %v417_v37 = vpop.xlane.xlu1 %416 }
 0x3e6   :  { %v422_v38 = vrot.slane %v417_v37, %v716_v48  ;;  %v426_v39 = vrot.slane %v417_v37, %v387_v19 }
 0x3e8   :  { %536 = vrcp.f32 %v422_v38 }
 0x3e9   :  { %538 = vrcp.f32 %v426_v39  ;;  %v360_v46 = vpop.xlane.xlu1 %359 }
 0x3f5   :  { %v537_v40 = vpop.eup %536 }
 0x3f6   :  { %v539_v41 = vpop.eup %538  ;;  %v430_v42 = vmul.f32 %v537_v40, %v533_v27 }
 0x3f7   :  { %v432_v44 = vmul.f32 %v539_v41, %v535_v28 }
 0x3f8   :  { %v433_v45 = vmul.f32 %v430_v42, %v357_v43 }
 0x3f9   :  { %v434_v47 = vmul.f32 %v432_v44, %v360_v46 }
 0x3fa   :  { %438 = vperm.xlu1 %519, %v433_v45  }
 0x3fe   :  { %441 = vperm.xlu1 %519, %v434_v47  }
 0x475   :  { %v439_v49 = vpop.permute.xlu1 %438 }
 0x476   :  { %v446_v51 = vrot.slane %v439_v49, %v367_v11 }
 0x479   :  { %v442_v50 = vpop.permute.xlu1 %441 }
 0x47a   :  { %v450_v52 = vrot.slane %v442_v50, %v367_v11 }
 0x47c   :  { %v451_v48 = vsel %vm373_vm9, %v450_v52, %v446_v51 }
 0x47d   :  { %453 = vst.msk [vmem:[#allocation10] sm:$0x3] %vm376_vm10, %v451_v48 }
 0x47e   :  { %631 = shalt.err (!%p628_p10)
}
 0x47f   :  { %463 = dma.vmem_to_hbm [thread:$0]  %s461_s3, 32, %s747_s4, [#allocation4]  }
 0x480   :  { %646 = dma.done.wait [#allocation4], 32  }
 0x481   :  { %647 = vsyncadd [#allocation4], 4294967264 }
 0x482   :  { %467 = vsyncpa [#allocation3], 1 }
 0x483   :  { %468 = vsyncpa [#allocation6], 1 }
 0x484   :  { %469 = vsyncpa [#allocation9], 1 }
 0x485   :  { %470 = vsyncpa [#allocation4], 1 }

</bundles_post_ra>
